<compile_context>
chip_gen: v7x
topology: tpu7x:2x2x1
jax: 0.10.0
libtpu: 0.0.40
codegen_flags: <defaults>
</compile_context>

<pallas_src>
import functools

import jax
import jax.numpy as jnp
from jax.experimental import pallas as pl
from jax.experimental.pallas import tpu as pltpu

LN_EPS = 1e-12


def _round_up(a: int, b: int) -> int:
    return ((a + b - 1) // b) * b


def _make_kernel(c_out_valid: int):
    inv_n = 1.0 / float(c_out_valid)

    def kernel(x_ref, w_ref, b_ref, g_ref, beta_ref, o_ref):
        # Linear: native-dtype tiles straight to the MXU, f32 accumulation.
        y = jnp.dot(x_ref[...], w_ref[...], preferred_element_type=jnp.float32)
        y = y + b_ref[...].astype(jnp.float32)

        # LayerNorm over the feature axis. Padded C_out lanes (if any) are exact
        # zeros (zero-padded weight columns + zero bias), so they contribute
        # nothing to the sums -> no lane mask needed.
        s1 = jnp.sum(y, axis=-1, keepdims=True)
        s2 = jnp.sum(y * y, axis=-1, keepdims=True)
        mean = s1 * inv_n
        var = jnp.maximum(s2 * inv_n - mean * mean, 0.0)  # biased var (torch LN)
        inv = jax.lax.rsqrt(var + LN_EPS)
        out = (y - mean) * inv * g_ref[...].astype(jnp.float32) \
              + beta_ref[...].astype(jnp.float32)

        # Dropout == identity (inference / eval() semantics).
        o_ref[...] = out.astype(o_ref.dtype)

    return kernel


@functools.partial(jax.jit, static_argnames=("tm",))
def feature_resizer(x, w, b, gamma, beta, *, tm=1024):
    """x: (..., C_in) -> (..., C_out). w: (C_in, C_out)."""
    orig_shape = x.shape
    c_in = orig_shape[-1]
    c_out = w.shape[1]
    x2 = x.reshape(-1, c_in)
    m = x2.shape[0]

    # Lane-dense output: pad ONLY the tiny parameters along C_out to a multiple
    # of 128 (cheap); x is left untouched (its last dim equals the full array dim,
    # which satisfies the BlockSpec constraint without padding).
    c_out_p = _round_up(c_out, 128)
    pad_o = c_out_p - c_out
    wp = jnp.pad(w, ((0, 0), (0, pad_o))) if pad_o else w
    b2 = (jnp.pad(b, (0, pad_o)) if pad_o else b).reshape(1, c_out_p)
    g2 = (jnp.pad(gamma, (0, pad_o)) if pad_o else gamma).reshape(1, c_out_p)
    beta2 = (jnp.pad(beta, (0, pad_o)) if pad_o else beta).reshape(1, c_out_p)

    # Row tile: as large as useful, capped so the double-buffered x/out tiles plus
    # the resident parameters fit the smallest default scoped-VMEM budget across
    # generations (v5e: 16 MiB scoped; v6e/v7x: 32 MiB scoped, v7x physical 64 MiB).
    itemsize = jnp.dtype(x.dtype).itemsize
    w_itemsize = jnp.dtype(w.dtype).itemsize
    param_bytes = 2 * (c_in * c_out_p + 3 * c_out_p) * w_itemsize
    budget = 12 * 1024 * 1024 - param_bytes
    # double-buffered in + out tiles per row, plus f32 temps for the epilogue
    row_bytes = 2 * (c_in + c_out_p) * itemsize + 4 * c_out_p
    tm_cap = max(8, (max(budget, 0) // max(row_bytes, 1)) // 8 * 8)

    tm_eff = max(8, min(_round_up(int(tm), 8), _round_up(m, 8), tm_cap))

    out = pl.pallas_call(
        _make_kernel(c_out),
        out_shape=jax.ShapeDtypeStruct((m, c_out_p), x.dtype),
        grid_spec=pltpu.PrefetchScalarGridSpec(
            num_scalar_prefetch=0,
            grid=(pl.cdiv(m, tm_eff),),   # partial last row-block handled by Pallas
            in_specs=[
                pl.BlockSpec((tm_eff, c_in), lambda i: (i, 0)),     # row tile of x
                # Invariant operands (constant index_map -> resident across grid).
                pl.BlockSpec((c_in, c_out_p), lambda i: (0, 0)),    # full weight
                pl.BlockSpec((1, c_out_p), lambda i: (0, 0)),       # bias
                pl.BlockSpec((1, c_out_p), lambda i: (0, 0)),       # LN gamma
                pl.BlockSpec((1, c_out_p), lambda i: (0, 0)),       # LN beta
            ],
            out_specs=pl.BlockSpec((tm_eff, c_out_p), lambda i: (i, 0)),
        ),
        compiler_params=pltpu.CompilerParams(
            # Row tiles are independent -> shard across TensorCores (v7x megacore).
            dimension_semantics=("parallel",),
        ),
    )(x2, wp, b2, g2, beta2)

    if pad_o:
        out = out[:, :c_out]
    return out.reshape(*orig_shape[:-1], c_out)


def _reference(x, w, b, gamma, beta):
    y = jnp.einsum("...i,io->...o", x.astype(jnp.float32), w.astype(jnp.float32)) + b
    mean = jnp.mean(y, axis=-1, keepdims=True)
    var = jnp.mean((y - mean) ** 2, axis=-1, keepdims=True)
    y = (y - mean) / jnp.sqrt(var + LN_EPS)
    return y * gamma + beta


if __name__ == "__main__":
    key = jax.random.PRNGKey(0)

    # Case 1: small shapes implied by the module (batch=2, seq=8, C1=32 -> C2=64);
    # exercises the C_out-padding (64 -> 128) path.
    B, S, C1, C2 = 2, 8, 32, 64
    kx, kw, kb, kg, kbeta, key = jax.random.split(key, 6)
    x = jax.random.normal(kx, (B, S, C1), dtype=jnp.float32)
    w = jax.random.normal(kw, (C1, C2), dtype=jnp.float32) * (1.0 / jnp.sqrt(C1))
    b = jax.random.normal(kb, (C2,), dtype=jnp.float32) * 0.02
    gamma = jnp.ones((C2,), dtype=jnp.float32) + 0.1 * jax.random.normal(kg, (C2,), dtype=jnp.float32)
    beta = 0.05 * jax.random.normal(kbeta, (C2,), dtype=jnp.float32)

    out = jax.block_until_ready(feature_resizer(x, w, b, gamma, beta))
    ref = _reference(x, w, b, gamma, beta)
    assert out.shape == (B, S, C2), out.shape
    assert jnp.allclose(out, ref, atol=1e-4, rtol=1e-4), "mismatch vs reference (case 1)"

    # Case 2: non-divisible row count (15 rows) + non-128 C_in (160), C_out=256;
    # exercises the partial final row block and lane-dense (unpadded) output path.
    B2, S2, C1b, C2b = 3, 5, 160, 256
    kx2, kw2, kb2, kg2, kbeta2, key = jax.random.split(key, 6)
    x2 = jax.random.normal(kx2, (B2, S2, C1b), dtype=jnp.float32)
    w2 = jax.random.normal(kw2, (C1b, C2b), dtype=jnp.float32) * (1.0 / jnp.sqrt(C1b))
    b2 = jax.random.normal(kb2, (C2b,), dtype=jnp.float32) * 0.02
    g2 = jnp.ones((C2b,), dtype=jnp.float32) + 0.1 * jax.random.normal(kg2, (C2b,), dtype=jnp.float32)
    bt2 = 0.05 * jax.random.normal(kbeta2, (C2b,), dtype=jnp.float32)

    out2 = jax.block_until_ready(feature_resizer(x2, w2, b2, g2, bt2))
    ref2 = _reference(x2, w2, b2, g2, bt2)
    assert out2.shape == (B2, S2, C2b), out2.shape
    assert jnp.allclose(out2, ref2, atol=1e-4, rtol=1e-4), "mismatch vs reference (case 2)"

    print("KERNEL_OK")
</pallas_src>

<mosaic_0001>
module attributes {stable_mosaic.version = 11 : i64} {
  func.func @kernel(%arg0: i32, %arg1: memref<16x32xf32, #tpu.memory_space<vmem>>, %arg2: memref<32x128xf32, #tpu.memory_space<vmem>>, %arg3: memref<1x128xf32, #tpu.memory_space<vmem>>, %arg4: memref<1x128xf32, #tpu.memory_space<vmem>>, %arg5: memref<1x128xf32, #tpu.memory_space<vmem>>, %arg6: memref<16x128xf32, #tpu.memory_space<vmem>>) attributes {dimension_semantics = [#tpu.dimension_semantics<parallel>], iteration_bounds = array<i64: 1>, scalar_prefetch = 0 : i64, scratch_operands = 0 : i64, tpu.core_type = #tpu.core_type<tc>, window_params = [{transform_indices = @transform_0, window_bounds = array<i64: 16, 32>}, {pipeline_mode = #tpu.pipeline_mode<synchronous>, transform_indices = @transform_1, window_bounds = array<i64: 32, 128>}, {pipeline_mode = #tpu.pipeline_mode<synchronous>, transform_indices = @transform_2, window_bounds = array<i64: 1, 128>}, {pipeline_mode = #tpu.pipeline_mode<synchronous>, transform_indices = @transform_3, window_bounds = array<i64: 1, 128>}, {pipeline_mode = #tpu.pipeline_mode<synchronous>, transform_indices = @transform_4, window_bounds = array<i64: 1, 128>}, {transform_indices = @transform_5, window_bounds = array<i64: 16, 128>}]} {
    %c0 = arith.constant 0 : index
    %c0_0 = arith.constant 0 : index
    %0 = vector.load %arg1[%c0, %c0_0] : memref<16x32xf32, #tpu.memory_space<vmem>>, vector<16x32xf32>
    %c0_1 = arith.constant 0 : index
    %c0_2 = arith.constant 0 : index
    %1 = vector.load %arg2[%c0_1, %c0_2] : memref<32x128xf32, #tpu.memory_space<vmem>>, vector<32x128xf32>
    %cst = arith.constant dense<0.000000e+00> : vector<16x128xf32>
    %2 = tpu.matmul %0, %1, %cst {dimension_numbers = #tpu.dot_dimension_numbers<[1], [0], [0], [1], [0, 0, 1, 1], [], []>} : vector<16x32xf32>, vector<32x128xf32>, vector<16x128xf32> -> vector<16x128xf32>
    %c0_3 = arith.constant 0 : index
    %c0_4 = arith.constant 0 : index
    %3 = vector.load %arg3[%c0_3, %c0_4] : memref<1x128xf32, #tpu.memory_space<vmem>>, vector<1x128xf32>
    %4 = vector.broadcast %3 : vector<1x128xf32> to vector<16x128xf32>
    %5 = arith.addf %2, %4 : vector<16x128xf32>
    %cst_5 = arith.constant dense<0.000000e+00> : vector<16xf32>
    %6 = vector.multi_reduction <add>, %5, %cst_5 [1] : vector<16x128xf32> to vector<16xf32>
    %7 = vector.shape_cast %6 : vector<16xf32> to vector<16x1xf32>
    %8 = arith.mulf %5, %5 : vector<16x128xf32>
    %cst_6 = arith.constant dense<0.000000e+00> : vector<16xf32>
    %9 = vector.multi_reduction <add>, %8, %cst_6 [1] : vector<16x128xf32> to vector<16xf32>
    %10 = vector.shape_cast %9 : vector<16xf32> to vector<16x1xf32>
    %cst_7 = arith.constant 1.562500e-02 : f32
    %11 = vector.broadcast %cst_7 : f32 to vector<16x1xf32>
    %12 = arith.mulf %7, %11 : vector<16x1xf32>
    %cst_8 = arith.constant 1.562500e-02 : f32
    %13 = vector.broadcast %cst_8 : f32 to vector<16x1xf32>
    %14 = arith.mulf %10, %13 : vector<16x1xf32>
    %15 = arith.mulf %12, %12 : vector<16x1xf32>
    %16 = arith.subf %14, %15 : vector<16x1xf32>
    %cst_9 = arith.constant 0.000000e+00 : f32
    %17 = vector.broadcast %cst_9 : f32 to vector<16x1xf32>
    %18 = arith.maximumf %16, %17 : vector<16x1xf32>
    %cst_10 = arith.constant 9.99999996E-13 : f32
    %19 = vector.broadcast %cst_10 : f32 to vector<16x1xf32>
    %20 = arith.addf %18, %19 : vector<16x1xf32>
    %21 = math.rsqrt %20 : vector<16x1xf32>
    %22 = vector.broadcast %12 : vector<16x1xf32> to vector<16x128xf32>
    %23 = arith.subf %5, %22 : vector<16x128xf32>
    %24 = vector.broadcast %21 : vector<16x1xf32> to vector<16x128xf32>
    %25 = arith.mulf %23, %24 : vector<16x128xf32>
    %c0_11 = arith.constant 0 : index
    %c0_12 = arith.constant 0 : index
    %26 = vector.load %arg4[%c0_11, %c0_12] : memref<1x128xf32, #tpu.memory_space<vmem>>, vector<1x128xf32>
    %27 = vector.broadcast %26 : vector<1x128xf32> to vector<16x128xf32>
    %28 = arith.mulf %25, %27 : vector<16x128xf32>
    %c0_13 = arith.constant 0 : index
    %c0_14 = arith.constant 0 : index
    %29 = vector.load %arg5[%c0_13, %c0_14] : memref<1x128xf32, #tpu.memory_space<vmem>>, vector<1x128xf32>
    %30 = vector.broadcast %29 : vector<1x128xf32> to vector<16x128xf32>
    %31 = arith.addf %28, %30 : vector<16x128xf32>
    %c0_15 = arith.constant 0 : index
    %c0_16 = arith.constant 0 : index
    %32 = vector.load %arg6[%c0_15, %c0_16] : memref<16x128xf32, #tpu.memory_space<vmem>>, vector<16x128xf32>
    tpu.vector_store %arg6[%c0_15, %c0_16], %31 {strides = array<i32>} : memref<16x128xf32, #tpu.memory_space<vmem>>, vector<16x128xf32>,
    return
  }
  func.func @transform_0(%arg0: i32) -> (i32, i32) {
    %c0_i32 = arith.constant 0 : i32
    %c0_i32_0 = arith.constant 0 : i32
    return %arg0, %c0_i32 : i32, i32
  }
  func.func @transform_1(%arg0: i32) -> (i32, i32) {
    %c0_i32 = arith.constant 0 : i32
    %c0_i32_0 = arith.constant 0 : i32
    %c0_i32_1 = arith.constant 0 : i32
    return %c0_i32, %c0_i32_0 : i32, i32
  }
  func.func @transform_2(%arg0: i32) -> (i32, i32) {
    %c0_i32 = arith.constant 0 : i32
    %c0_i32_0 = arith.constant 0 : i32
    %c0_i32_1 = arith.constant 0 : i32
    return %c0_i32, %c0_i32_0 : i32, i32
  }
  func.func @transform_3(%arg0: i32) -> (i32, i32) {
    %c0_i32 = arith.constant 0 : i32
    %c0_i32_0 = arith.constant 0 : i32
    %c0_i32_1 = arith.constant 0 : i32
    return %c0_i32, %c0_i32_0 : i32, i32
  }
  func.func @transform_4(%arg0: i32) -> (i32, i32) {
    %c0_i32 = arith.constant 0 : i32
    %c0_i32_0 = arith.constant 0 : i32
    %c0_i32_1 = arith.constant 0 : i32
    return %c0_i32, %c0_i32_0 : i32, i32
  }
  func.func @transform_5(%arg0: i32) -> (i32, i32) {
    %c0_i32 = arith.constant 0 : i32
    %c0_i32_0 = arith.constant 0 : i32
    return %arg0, %c0_i32 : i32, i32
  }
}

</mosaic_0001>

<bundles_post_ra>
// kernel: feature_resizer.1
= control target key start
LH: loop header
LB: loop body
LE: loop exit
PB: predicated region body
PF: predicated region fallthrough
CT: control target
= control target key end

     0   :  { %vm33_vm0 = vcmask 261120   ;;  %s264_s1 = inlined_call_operand.vmem [shape: f32[32,128], index: 1, kind: input, shape index: {}]   ;;  %s265_s0 = inlined_call_operand.vmem [shape: f32[16,32], index: 0, kind: input, shape index: {}]   ;;  %s266_s2 = inlined_call_operand.vmem [shape: f32[1,128], index: 2, kind: input, shape index: {}]   ;;  %s267_s3 = inlined_call_operand.vmem [shape: f32[1,128], index: 3, kind: input, shape index: {}]   ;;  %s268_s4 = inlined_call_operand.vmem [shape: f32[1,128], index: 4, kind: input, shape index: {}]   ;;  %s269_s5 = inlined_call_operand.vmem [shape: f32[16,128], index: 5, kind: output, shape index: {}]  }
   0x1   :  { %v22_v0 = vld [vmem:[%s264_s1] sm:$0xff]  ;;  %v23_v1 = vld [vmem:[%s264_s1 + $0x8] sm:$0xff]  ;;  %v24_v2 = vld [vmem:[%s264_s1 + $0x10] sm:$0xff] }
   0x2   :  { %v189_v3 = vpack.c.bf16 %v23_v1, %v22_v0  ;;  %v25_v4 = vld [vmem:[%s264_s1 + $0x18] sm:$0xff]  ;;  %v20_v5 = vld [vmem:[%s265_s0] sm:$0xff]  ;;  %v21_v7 = vld [vmem:[%s265_s0 + $0x8] sm:$0xff] }
   0x3   :  { %v193_v6 = vpack.c.bf16 %v25_v4, %v24_v2  ;;  %186 = vmatprep.mubr.msk.f32.mxu0 %vm33_vm0, %v20_v5  ;;  %v167_v8 = vld [vmem:[%s266_s2] ss:$0 sm:$0xff] }
   0x4   :  { %190 = vmatprep.subr.bf16.mxu0 %v189_v3  ;;  %v170_v33 = vld [vmem:[%s267_s3] ss:$0 sm:$0xff] }
   0x5   :  { %192 = vmatpush3.bf16.msra.mxu0 %v189_v3  ;;  %v171_v35 = vld [vmem:[%s268_s4] ss:$0 sm:$0xff] }
   0x6   :  { %194 = vmatprep.subr.bf16.mxu0 %v193_v6 }
   0x9   :  { %196 = vmatpush3.bf16.msra.mxu0 %v193_v6 }
   0xc   :  { %187 = vmatmul.mubr.msk.f32.vlgmr.msra.gmra.mrb[0].mxu0 %vm33_vm0, %v21_v7 }
  0xdf   :  { %v188_v9 = vpop.f32.mrb[0].mxu0 }
  0xe0   :  { %v106_v10 = vpop.f32.mrb[1].mxu0  ;;  %v112_v12 = vadd.f32 %v188_v9, %v167_v8 }
  0xe1   :  { %v107_v11 = vadd.f32 %v167_v8, %v106_v10 }
  0xe2   :  { %v120_v14 = vmul.f32 %v112_v12, %v112_v12 }
  0xe3   :  { %115 = vadd.xlane.f32.xlu0 %v107_v11  ;;  %v119_v13 = vmul.f32 %v107_v11, %v107_v11 }
  0xe5   :  { %121 = vadd.xlane.f32.xlu1 %v119_v13 }
  0xe7   :  { %117 = vadd.xlane.f32.xlu0 %v112_v12 }
  0xe9   :  { %123 = vadd.xlane.f32.xlu1 %v120_v14 }
 0x170   :  { %v116_v15 = vpop.xlane.xlu0 %115 }
 0x171   :  { %v125_v16 = vmul.f32 0.015625, %v116_v15 }
 0x172   :  { %v122_v17 = vpop.xlane.xlu1 %121 }
 0x173   :  { %v129_v18 = vmul.f32 %v125_v16, %v125_v16  ;;  %v127_v19 = vmul.f32 0.015625, %v122_v17  ;;  %v139_v31 = vsub.f32 %v107_v11, %v125_v16 }
 0x174   :  { %v118_v20 = vpop.xlane.xlu0 %117 }
 0x175   :  { %v131_v21 = vsub.f32 %v127_v19, %v129_v18  ;;  %v126_v22 = vmul.f32 0.015625, %v118_v20 }
 0x176   :  { %v124_v23 = vpop.xlane.xlu1 %123 }
 0x177   :  { %v133_v24 = vmax.f32 %v131_v21, 0.0  ;;  %v130_v25 = vmul.f32 %v126_v22, %v126_v22  ;;  %v128_v26 = vmul.f32 0.015625, %v124_v23  ;;  %v140_v37 = vsub.f32 %v112_v12, %v126_v22 }
 0x179   :  { %v135_v27 = vadd.f32 1e-12, %v133_v24  ;;  %v132_v28 = vsub.f32 %v128_v26, %v130_v25 }
 0x17b   :  { %197 = vrsqrt.f32 %v135_v27  ;;  %v134_v29 = vmax.f32 %v132_v28, 0.0 }
 0x17d   :  { %v136_v30 = vadd.f32 1e-12, %v134_v29 }
 0x17f   :  { %199 = vrsqrt.f32 %v136_v30 }
 0x185   :  { %v198_v32 = vpop.eup %197 }
 0x186   :  { %v141_v34 = vmul.f32 %v198_v32, %v139_v31 }
 0x188   :  { %v150_v36 = vmul.f32 %v170_v33, %v141_v34 }
 0x189   :  { %v200_v38 = vpop.eup %199 }
 0x18a   :  { %v159_v39 = vadd.f32 %v171_v35, %v150_v36  ;;  %v142_v40 = vmul.f32 %v200_v38, %v140_v37 }
 0x18c   :  { %161 = vst [vmem:[%s269_s5] sm:$0xff] %v159_v39  ;;  %v151_v41 = vmul.f32 %v170_v33, %v142_v40 }
 0x18e   :  { %v160_v42 = vadd.f32 %v171_v35, %v151_v41 }
 0x190   :  { %162 = vst [vmem:[%s269_s5 + $0x8] sm:$0xff] %v160_v42 }

</bundles_post_ra>
